<compile_context>
chip_gen: v5e
topology: v5e:2x2
jax: 0.10.0
libtpu: 0.0.40
codegen_flags: <defaults>
</compile_context>

<pallas_src>
import functools

import jax
import jax.numpy as jnp
from jax.experimental import pallas as pl
from jax.experimental.pallas import tpu as pltpu

block_size = 64   # max context length (for the causal mask)
n_emb_d = 384     # embedding dimension (hard-coded in the PyTorch module)


def _head_kernel(x_ref, wqkv_ref, o_ref, *, scale, compute_dtype):
    # x_ref:    (Bb, T, C)   -- Bb batch elements per grid step
    # wqkv_ref: (C, 3H)      -- packed [Wq | Wk | Wv]
    # o_ref:    (Bb, T, H)
    bb, T, C = x_ref.shape
    H = o_ref.shape[-1]

    # Flatten the batch into the matmul M dimension so the projection runs as
    # one big (Bb*T, C) @ (C, 3H) MXU matmul (T is a multiple of 8 in practice
    # so this reshape is layout-free).
    x = x_ref[...].reshape(bb * T, C).astype(compute_dtype)
    w = wqkv_ref[...].astype(compute_dtype)
    qkv = jnp.dot(x, w, preferred_element_type=jnp.float32)        # (Bb*T, 3H) f32

    q = qkv[:, 0 * H:1 * H].reshape(bb, T, H)
    k = qkv[:, 1 * H:2 * H].reshape(bb, T, H)
    v = qkv[:, 2 * H:3 * H].reshape(bb, T, H)

    # attention scores, scaled by C**-0.5 (C = n_emb_d, as in the reference).
    # Contract on the last dim of both operands: no explicit transpose of k.
    wei = jnp.einsum(
        'bqd,bkd->bqk',
        q.astype(compute_dtype), k.astype(compute_dtype),
        preferred_element_type=jnp.float32) * scale                 # (Bb, T, T)

    # causal mask: keep col <= row, else -inf (row 0 always has col 0 valid,
    # so no fully-masked rows -> no NaN from the softmax).
    row = jax.lax.broadcasted_iota(jnp.int32, (T, T), 0)
    col = jax.lax.broadcasted_iota(jnp.int32, (T, T), 1)
    wei = jnp.where((col <= row)[None, :, :], wei, -jnp.inf)

    # numerically stable softmax over the last axis
    wei = wei - jnp.max(wei, axis=-1, keepdims=True)
    p = jnp.exp(wei)
    p = p * pl.reciprocal(jnp.sum(p, axis=-1, keepdims=True), approx=True)

    # dropout: identity in eval mode

    out = jnp.einsum(
        'bqk,bkd->bqd',
        p.astype(compute_dtype), v.astype(compute_dtype),
        preferred_element_type=jnp.float32)                          # (Bb, T, H)
    o_ref[...] = out.astype(o_ref.dtype)


def head_forward(x, w_key, w_query, w_value, *,
                 batch_block=None, compute_dtype=jnp.bfloat16):
    """x: (B, T, C); w_*: (C, H)  ->  (B, T, H).

    compute_dtype: dtype of the MXU matmul operands (accumulation is always
    float32). bfloat16 is ~2-3x faster on v6e/v7x; pass jnp.float32 for strict
    accuracy.
    """
    B, T, C = x.shape
    H = w_key.shape[1]
    assert C == n_emb_d and T <= block_size

    # Pick how many batch elements to process per grid step: aim for a matmul
    # M dimension (Bb*T) of ~512 rows, and make Bb divide B so every block is
    # full (no padded garbage to handle).
    if batch_block is None:
        batch_block = max(1, 512 // max(T, 1))
    Bb = max(1, min(batch_block, B))
    while B % Bb:
        Bb -= 1
    grid = (B // Bb,)

    # Pack the three projections into one (C, 3H) weight: single DMA'd weight
    # block + single wide projection matmul. Order: [q | k | v].
    w_qkv = jnp.concatenate([w_query, w_key, w_value], axis=1)

    scale = float(C) ** (-0.5)
    kernel = functools.partial(_head_kernel, scale=scale,
                               compute_dtype=compute_dtype)

    itemsize = jnp.dtype(x.dtype).itemsize
    cost = pl.CostEstimate(
        flops=2 * B * (3 * T * C * H + 2 * T * T * H),
        transcendentals=B * T * T,
        bytes_accessed=(B * T * C + C * 3 * H + B * T * H) * itemsize,
    )

    # VMEM footprint per step (x block + weights + out, double-buffered) is
    # small (< ~2 MiB for Bb=8, T=64); well under the scoped limit even on the
    # 64 MiB v7x. Raise vmem_limit_bytes only if Bb is grown a lot.
    return pl.pallas_call(
        kernel,
        out_shape=jax.ShapeDtypeStruct((B, T, H), x.dtype),
        grid_spec=pltpu.PrefetchScalarGridSpec(
            num_scalar_prefetch=0,
            grid=grid,
            in_specs=[
                pl.BlockSpec((Bb, T, C), lambda b: (b, 0, 0)),
                pl.BlockSpec((C, 3 * H), lambda b: (0, 0)),
            ],
            out_specs=pl.BlockSpec((Bb, T, H), lambda b: (b, 0, 0)),
        ),
        compiler_params=pltpu.CompilerParams(
            dimension_semantics=("parallel",)),
        cost_estimate=cost,
    )(x, w_qkv)


def _reference(x, w_key, w_query, w_value):
    B, T, C = x.shape
    k = x @ w_key
    q = x @ w_query
    v = x @ w_value
    wei = (q @ jnp.swapaxes(k, -2, -1)) * (C ** -0.5)
    mask = jnp.tril(jnp.ones((T, T), dtype=bool))
    wei = jnp.where(mask, wei, -jnp.inf)
    wei = jax.nn.softmax(wei, axis=-1)
    return wei @ v


if __name__ == "__main__":
    key = jax.random.PRNGKey(0)
    B, T, C = 8, 16, n_emb_d
    head_size = 32

    k_x, k_wk, k_wq, k_wv = jax.random.split(key, 4)
    x = jax.random.normal(k_x, (B, T, C), dtype=jnp.float32)
    # nn.Linear(n_emb_d, head_size, bias=False)-style init, stored as (C, H)
    bound = 1.0 / (C ** 0.5)
    w_key_p = jax.random.uniform(k_wk, (C, head_size), jnp.float32, -bound, bound)
    w_query_p = jax.random.uniform(k_wq, (C, head_size), jnp.float32, -bound, bound)
    w_value_p = jax.random.uniform(k_wv, (C, head_size), jnp.float32, -bound, bound)

    ref = _reference(x, w_key_p, w_query_p, w_value_p)

    # float32-operand path, multi-step grid (batch_block=4 -> grid=(2,))
    out_f32 = head_forward(x, w_key_p, w_query_p, w_value_p,
                           batch_block=4, compute_dtype=jnp.float32)
    jax.block_until_ready(out_f32)
    assert out_f32.shape == (B, T, head_size)
    assert jnp.allclose(out_f32, ref, atol=5e-3, rtol=5e-3)

    # default path: bf16 MXU operands, auto batch tiling
    out_bf16 = head_forward(x, w_key_p, w_query_p, w_value_p)
    jax.block_until_ready(out_bf16)
    assert out_bf16.shape == (B, T, head_size)
    assert jnp.allclose(out_bf16, ref, atol=3e-2, rtol=3e-2)

    print("KERNEL_OK")
</pallas_src>

<mosaic_0001>
module attributes {stable_mosaic.version = 11 : i64} {
  func.func @_head_kernel(%arg0: i32, %arg1: memref<4x16x384xf32, #tpu.memory_space<vmem>>, %arg2: memref<384x96xf32, #tpu.memory_space<vmem>>, %arg3: memref<4x16x32xf32, #tpu.memory_space<vmem>>) attributes {dimension_semantics = [#tpu.dimension_semantics<parallel>], iteration_bounds = array<i64: 2>, scalar_prefetch = 0 : i64, scratch_operands = 0 : i64, tpu.core_type = #tpu.core_type<tc>, window_params = [{transform_indices = @transform_0, window_bounds = array<i64: 4, 16, 384>}, {pipeline_mode = #tpu.pipeline_mode<synchronous>, transform_indices = @transform_1, window_bounds = array<i64: 384, 96>}, {transform_indices = @transform_2, window_bounds = array<i64: 4, 16, 32>}]} {
    %c0 = arith.constant 0 : index
    %c0_0 = arith.constant 0 : index
    %c0_1 = arith.constant 0 : index
    %0 = vector.load %arg1[%c0, %c0_0, %c0_1] : memref<4x16x384xf32, #tpu.memory_space<vmem>>, vector<4x16x384xf32>
    %1 = vector.shape_cast %0 : vector<4x16x384xf32> to vector<64x384xf32>
    %c0_2 = arith.constant 0 : index
    %c0_3 = arith.constant 0 : index
    %2 = vector.load %arg2[%c0_2, %c0_3] : memref<384x96xf32, #tpu.memory_space<vmem>>, vector<384x96xf32>
    %cst = arith.constant dense<0.000000e+00> : vector<64x96xf32>
    %3 = tpu.matmul %1, %2, %cst {dimension_numbers = #tpu.dot_dimension_numbers<[1], [0], [0], [1], [0, 0, 1, 1], [], []>} : vector<64x384xf32>, vector<384x96xf32>, vector<64x96xf32> -> vector<64x96xf32>
    %4 = vector.extract_strided_slice %3 {offsets = [0, 0], sizes = [64, 32], strides = [1, 1]} : vector<64x96xf32> to vector<64x32xf32>
    %5 = vector.shape_cast %4 : vector<64x32xf32> to vector<4x16x32xf32>
    %6 = vector.extract_strided_slice %3 {offsets = [0, 32], sizes = [64, 32], strides = [1, 1]} : vector<64x96xf32> to vector<64x32xf32>
    %7 = vector.shape_cast %6 : vector<64x32xf32> to vector<4x16x32xf32>
    %8 = vector.extract_strided_slice %3 {offsets = [0, 64], sizes = [64, 32], strides = [1, 1]} : vector<64x96xf32> to vector<64x32xf32>
    %9 = vector.shape_cast %8 : vector<64x32xf32> to vector<4x16x32xf32>
    "tpu.trace_start"() <{level = 10 : i32, message = "bqd,bkd->bqk"}> : () -> ()
    %cst_4 = arith.constant dense<0.000000e+00> : vector<4x16x16xf32>
    %10 = tpu.matmul %5, %7, %cst_4 {dimension_numbers = #tpu.dot_dimension_numbers<[2], [2], [1], [1], [0, 0, 0, 1, 1, 1], [0], [0]>} : vector<4x16x32xf32>, vector<4x16x32xf32>, vector<4x16x16xf32> -> vector<4x16x16xf32>
    "tpu.trace_stop"() : () -> ()
    %cst_5 = arith.constant 0.0510310382 : f32
    %11 = vector.broadcast %cst_5 : f32 to vector<4x16x16xf32>
    %12 = arith.mulf %10, %11 : vector<4x16x16xf32>
    %13 = tpu.iota {dimensions = array<i32: 0>} : vector<16x16xi32>
    %14 = tpu.iota {dimensions = array<i32: 1>} : vector<16x16xi32>
    %15 = arith.cmpi sle, %14, %13 : vector<16x16xi32>
    %16 = vector.shape_cast %15 : vector<16x16xi1> to vector<1x16x16xi1>
    %cst_6 = arith.constant 0xFF800000 : f32
    %17 = vector.shape_cast %16 : vector<1x16x16xi1> to vector<1x16x16xi1>
    %18 = vector.broadcast %17 : vector<1x16x16xi1> to vector<4x16x16xi1>
    %19 = vector.broadcast %cst_6 : f32 to vector<4x16x16xf32>
    %20 = arith.select %18, %12, %19 : vector<4x16x16xi1>, vector<4x16x16xf32>
    %cst_7 = arith.constant dense<0xFF800000> : vector<4x16xf32>
    %21 = vector.multi_reduction <maximumf>, %20, %cst_7 [2] : vector<4x16x16xf32> to vector<4x16xf32>
    %22 = vector.shape_cast %21 : vector<4x16xf32> to vector<4x16x1xf32>
    %23 = vector.broadcast %22 : vector<4x16x1xf32> to vector<4x16x16xf32>
    %24 = arith.subf %20, %23 : vector<4x16x16xf32>
    %25 = math.exp %24 : vector<4x16x16xf32>
    %cst_8 = arith.constant dense<0.000000e+00> : vector<4x16xf32>
    %26 = vector.multi_reduction <add>, %25, %cst_8 [2] : vector<4x16x16xf32> to vector<4x16xf32>
    %27 = vector.shape_cast %26 : vector<4x16xf32> to vector<4x16x1xf32>
    %28 = tpu.reciprocal %27 {approx = true} : vector<4x16x1xf32> -> vector<4x16x1xf32>
    %29 = vector.broadcast %28 : vector<4x16x1xf32> to vector<4x16x16xf32>
    %30 = arith.mulf %25, %29 : vector<4x16x16xf32>
    "tpu.trace_start"() <{level = 10 : i32, message = "bqk,bkd->bqd"}> : () -> ()
    %cst_9 = arith.constant dense<0.000000e+00> : vector<4x16x32xf32>
    %31 = tpu.matmul %30, %9, %cst_9 {dimension_numbers = #tpu.dot_dimension_numbers<[2], [1], [1], [2], [0, 0, 0, 1, 1, 2], [0], [0]>} : vector<4x16x16xf32>, vector<4x16x32xf32>, vector<4x16x32xf32> -> vector<4x16x32xf32>
    "tpu.trace_stop"() : () -> ()
    %c0_10 = arith.constant 0 : index
    %c0_11 = arith.constant 0 : index
    %c0_12 = arith.constant 0 : index
    %32 = vector.load %arg3[%c0_10, %c0_11, %c0_12] : memref<4x16x32xf32, #tpu.memory_space<vmem>>, vector<4x16x32xf32>
    tpu.vector_store %arg3[%c0_10, %c0_11, %c0_12], %31 {strides = array<i32>} : memref<4x16x32xf32, #tpu.memory_space<vmem>>, vector<4x16x32xf32>,
    return
  }
  func.func @transform_0(%arg0: i32) -> (i32, i32, i32) {
    %c0_i32 = arith.constant 0 : i32
    %c0_i32_0 = arith.constant 0 : i32
    %c0_i32_1 = arith.constant 0 : i32
    return %arg0, %c0_i32, %c0_i32_0 : i32, i32, i32
  }
  func.func @transform_1(%arg0: i32) -> (i32, i32) {
    %c0_i32 = arith.constant 0 : i32
    %c0_i32_0 = arith.constant 0 : i32
    %c0_i32_1 = arith.constant 0 : i32
    return %c0_i32, %c0_i32_0 : i32, i32
  }
  func.func @transform_2(%arg0: i32) -> (i32, i32, i32) {
    %c0_i32 = arith.constant 0 : i32
    %c0_i32_0 = arith.constant 0 : i32
    %c0_i32_1 = arith.constant 0 : i32
    return %arg0, %c0_i32, %c0_i32_0 : i32, i32, i32
  }
}

</mosaic_0001>

<bundles_post_ra>
// kernel: tpu_custom_call.1
= control target key start
LH: loop header
LB: loop body
LE: loop exit
PB: predicated region body
PF: predicated region fallthrough
CT: control target
= control target key end

     0   :  { %7 = vsyncpa [#allocation3], 0  ;;  %s1445_s0 = inlined_call_operand.vmem [shape: f32[8,16,384], index: 0, kind: input, shape index: {}]   ;;  %s1446_s1 = inlined_call_operand.vmem [shape: f32[384,96], index: 1, kind: input, shape index: {}]   ;;  %s1447_s2 = inlined_call_operand.hbm [shape: f32[8,16,32], index: 2, kind: output, shape index: {}]  }
   0x1   :  { %9 = vsyncpa [#allocation3 + $0x1], 0  ;;  %s1055_s9 = smov 0   ;;  %s1057_s10 = smov 0  }
   0x2   :  { %s1059_s11 = smov 0   ;;  %s1061_s12 = smov 0  }
   0x3 LB: > { %s1076_s13 = sadd.s32 4294967295, %s1034_s12   ;;  %s835_s14 = sadd.s32 4294967294, %s1034_s12   ;;  %s1034_s12 = sphi %s1061_s12, %s1453_s12   ;;  %s1030_s11 = sphi %s1059_s11, %s1452_s11   ;;  %s1026_s10 = sphi %s1057_s10, %s1451_s10   ;;  %s1022_s9 = sphi %s1055_s9, %s1450_s9  }
   0x4   : > { %s1080_s15 = sadd.s32 1, %s1034_s12   ;;  %s69_s16 = sadd.s32 1, %s1030_s11 }
   0x5   : > { %s66_s17 = ssub.s32 %s1034_s12, %s1080_s15  ;;  %p79_p0 = scmp.ne.s32.totalorder %s1030_s11, %s1026_s10 }
   0x6   : > { %p67_p1 = scmp.eq.s32.totalorder %s66_s17, 0  ;;  %p80_p2 = scmp.eq.s32.totalorder %s1076_s13, 1 }
   0x7   : > { %p85_p3 = scmp.ne.s32.totalorder %s1026_s10, %s1022_s9  ;;  %p86_p4 = scmp.eq.s32.totalorder %s835_s14, 1 }
   0x8   : > { %s1091_s18 = scalar_select %p67_p1, %s1030_s11, %s69_s16  }
   0x9   : > { %p1093_p5 = por %p80_p2, %p79_p0  ;;  %p1097_p6 = por %p86_p4, %p85_p3 }
   0xa   : > { %p838_p7 = scmp.ge.s32.totalorder %s1034_s12, 1  ;;  %p117_p8 = scmp.lt.s32.totalorder %s1034_s12, 3 }
   0xc   : > { %p118_p9 = pnand %p838_p7, %p117_p8 }
   0xd   : > { %s840_s25 = sshll.u32 (!%p118_p9), %s1076_s13, 2  ;;  %s1036_s29 = smov (!%p118_p9), 96  }
   0xe   : > { %121 = sbr.rel (%p118_p9) target bundleno = 927 (0x39f), region = 28  ;;  %p141_p10 = scmp.lt.s32.totalorder (!%p118_p9), %s840_s25, 7 }
   0xf   : > { %s1037_s30 = smov (!%p118_p9), 64   ;;  %s137_s3 = sand.u32 (!%p118_p9), 1, %s1026_s10  }
  0x10   : > { %s839_s4 = sshll.u32 (!%p118_p9), %s137_s3, 6  ;;  %s873_s5 = sshll.u32 (!%p118_p9), %s1076_s13, 6 }
  0x11   : > { %s757_s13 = scalar_lea.sflag (!%p118_p9), [#allocation3], %s137_s3 }
  0x13   : > { %v219_v0 = vld [vmem:[%s1446_s1 + $0x178] sm:$0xff]  ;;  %v218_v1 = vld [vmem:[%s1446_s1 + $0x170] sm:$0xff]  ;;  %v217_v5 = vld [vmem:[%s1446_s1 + $0x168] sm:$0xff]  ;;  %s1455_s25 = smov (!%p141_p10, %s840_s25), 7  ;;  %vm349_vm0 = vcmask 261120   ;;  %vm519_vm2 = vcmask 130048  }
  0x14   : > { %v187_v2 = vld [vmem:[%s1446_s1 + $0x78] sm:$0xff]  ;;  %302 = vmatpush.msra.mxu2 %v219_v0  ;;  %v186_v4 = vld [vmem:[%s1446_s1 + $0x70] sm:$0xff]  ;;  %v185_v7 = vld [vmem:[%s1446_s1 + $0x68] sm:$0xff]  ;;  %s876_s23 = smul.u32 48, %s1455_s25  ;;  %s139_s25 = scalar_lea.vmem [#allocation2], %s839_s4 }
  0x15   : > { %220 = vmatpush.msra.mxu0 %v187_v2  ;;  %v203_v3 = vld [vmem:[%s1446_s1 + $0xf8] sm:$0xff]  ;;  %v202_v6 = vld [vmem:[%s1446_s1 + $0xf0] sm:$0xff]  ;;  %v201_v8 = vld [vmem:[%s1446_s1 + $0xe8] sm:$0xff]  ;;  %s770_s14 = sshll.u32 %s139_s25, 4  ;;  %s771_s14 = int_to_ptr.vmem [resolvable:$true] %s770_s14 }
  0x16   : > { %261 = vmatpush.msra.mxu1 %v203_v3  ;;  %303 = vmatpush.msra.mxu2 %v218_v1  ;;  %v216_v9 = vld [vmem:[%s1446_s1 + $0x160] sm:$0xff]  ;;  %v215_v12 = vld [vmem:[%s1446_s1 + $0x158] sm:$0xff]  ;;  %v214_v15 = vld [vmem:[%s1446_s1 + $0x150] sm:$0xff]  ;;  %s1236_s8 = scalar_lea.vmem %s1445_s0, %s876_s23  ;;  %s992_s23 = scalar_lea.hbm %s1447_s2, 128 }
  0x17   : > { %221 = vmatpush.msra.mxu0 %v186_v4  ;;  %v184_v10 = vld [vmem:[%s1446_s1 + $0x60] sm:$0xff]  ;;  %v183_v13 = vld [vmem:[%s1446_s1 + $0x58] sm:$0xff]  ;;  %v182_v16 = vld [vmem:[%s1446_s1 + $0x50] sm:$0xff] }
  0x18   : > { %262 = vmatpush.msra.mxu1 %v202_v6  ;;  %304 = vmatpush.msra.mxu2 %v217_v5  ;;  %v200_v11 = vld [vmem:[%s1446_s1 + $0xe0] sm:$0xff]  ;;  %v199_v14 = vld [vmem:[%s1446_s1 + $0xd8] sm:$0xff]  ;;  %v198_v17 = vld [vmem:[%s1446_s1 + $0xd0] sm:$0xff] }
  0x19   : > { %222 = vmatpush.msra.mxu0 %v185_v7  ;;  %v213_v18 = vld [vmem:[%s1446_s1 + $0x148] sm:$0xff]  ;;  %v212_v21 = vld [vmem:[%s1446_s1 + $0x140] sm:$0xff]  ;;  %v211_v24 = vld [vmem:[%s1446_s1 + $0x138] sm:$0xff] }
  0x1a   : > { %263 = vmatpush.msra.mxu1 %v201_v8  ;;  %305 = vmatpush.msra.mxu2 %v216_v9  ;;  %v181_v19 = vld [vmem:[%s1446_s1 + $0x48] sm:$0xff]  ;;  %v180_v22 = vld [vmem:[%s1446_s1 + $0x40] sm:$0xff]  ;;  %v179_v25 = vld [vmem:[%s1446_s1 + $0x38] sm:$0xff] }
  0x1b   : > { %223 = vmatpush.msra.mxu0 %v184_v10  ;;  %v197_v20 = vld [vmem:[%s1446_s1 + $0xc8] sm:$0xff]  ;;  %v196_v23 = vld [vmem:[%s1446_s1 + $0xc0] sm:$0xff]  ;;  %v195_v26 = vld [vmem:[%s1446_s1 + $0xb8] sm:$0xff] }
  0x1c   : > { %264 = vmatpush.msra.mxu1 %v200_v11  ;;  %306 = vmatpush.msra.mxu2 %v215_v12  ;;  %v210_v27 = vld [vmem:[%s1446_s1 + $0x130] sm:$0xff]  ;;  %v209_v30 = vld [vmem:[%s1446_s1 + $0x128] sm:$0xff]  ;;  %v208_v33 = vld [vmem:[%s1446_s1 + $0x120] sm:$0xff] }
  0x1d   : > { %224 = vmatpush.msra.mxu0 %v183_v13  ;;  %v178_v28 = vld [vmem:[%s1446_s1 + $0x30] sm:$0xff]  ;;  %v177_v31 = vld [vmem:[%s1446_s1 + $0x28] sm:$0xff]  ;;  %v176_v34 = vld [vmem:[%s1446_s1 + $0x20] sm:$0xff] }
  0x1e   : > { %265 = vmatpush.msra.mxu1 %v199_v14  ;;  %307 = vmatpush.msra.mxu2 %v214_v15  ;;  %v194_v29 = vld [vmem:[%s1446_s1 + $0xb0] sm:$0xff]  ;;  %v193_v32 = vld [vmem:[%s1446_s1 + $0xa8] sm:$0xff]  ;;  %v192_v35 = vld [vmem:[%s1446_s1 + $0xa0] sm:$0xff] }
  0x1f   : > { %225 = vmatpush.msra.mxu0 %v182_v16  ;;  %v207_v36 = vld [vmem:[%s1446_s1 + $0x118] sm:$0xff]  ;;  %v206_v39 = vld [vmem:[%s1446_s1 + $0x110] sm:$0xff]  ;;  %v205_v42 = vld [vmem:[%s1446_s1 + $0x108] sm:$0xff] }
  0x20   : > { %266 = vmatpush.msra.mxu1 %v198_v17  ;;  %308 = vmatpush.msra.mxu2 %v213_v18  ;;  %v175_v37 = vld [vmem:[%s1446_s1 + $0x18] sm:$0xff]  ;;  %v174_v40 = vld [vmem:[%s1446_s1 + $0x10] sm:$0xff]  ;;  %v173_v43 = vld [vmem:[%s1446_s1 + $0x8] sm:$0xff] }
  0x21   : > { %226 = vmatpush.msra.mxu0 %v181_v19  ;;  %v191_v38 = vld [vmem:[%s1446_s1 + $0x98] sm:$0xff]  ;;  %v190_v41 = vld [vmem:[%s1446_s1 + $0x90] sm:$0xff]  ;;  %v189_v44 = vld [vmem:[%s1446_s1 + $0x88] sm:$0xff] }
  0x22   : > { %267 = vmatpush.msra.mxu1 %v197_v20  ;;  %309 = vmatpush.msra.mxu2 %v212_v21  ;;  %v204_v45 = vld [vmem:[%s1446_s1 + $0x100] sm:$0xff]  ;;  %v150_v47 = vld [vmem:[%s1236_s8 + $0x10] sm:$0xff]  ;;  %v149_v50 = vld [vmem:[%s1236_s8 + $0x8] sm:$0xff] }
  0x23   : > { %227 = vmatpush.msra.mxu0 %v180_v22  ;;  %v172_v46 = vld [vmem:[%s1446_s1] sm:$0xff]  ;;  %v153_v51 = vld [vmem:[%s1236_s8 + $0x28] sm:$0xff]  ;;  %v151_v52 = vld [vmem:[%s1236_s8 + $0x18] sm:$0xff] }
  0x24   : > { %268 = vmatpush.msra.mxu1 %v196_v23  ;;  %310 = vmatpush.msra.mxu2 %v211_v24  ;;  %v188_v48 = vld [vmem:[%s1446_s1 + $0x80] sm:$0xff]  ;;  %v154_v55 = vld [vmem:[%s1236_s8 + $0x30] sm:$0xff]  ;;  %v155_v56 = vld [vmem:[%s1236_s8 + $0x38] sm:$0xff] }
  0x25   : > { %228 = vmatpush.msra.mxu0 %v179_v25  ;;  %v148_v49 = vld [vmem:[%s1236_s8] sm:$0xff]  ;;  %v159_v57 = vld [vmem:[%s1236_s8 + $0x58] sm:$0xff]  ;;  %v157_v58 = vld [vmem:[%s1236_s8 + $0x48] sm:$0xff] }
  0x26   : > { %269 = vmatpush.msra.mxu1 %v195_v26  ;;  %311 = vmatpush.msra.mxu2 %v210_v27  ;;  %v152_v53 = vld [vmem:[%s1236_s8 + $0x20] sm:$0xff]  ;;  %v158_v59 = vld [vmem:[%s1236_s8 + $0x50] sm:$0xff]  ;;  %v161_v62 = vld [vmem:[%s1236_s8 + $0x68] sm:$0xff] }
  0x27   : > { %229 = vmatpush.msra.mxu0 %v178_v28  ;;  %v156_v54 = vld [vmem:[%s1236_s8 + $0x40] sm:$0xff]  ;;  %v162_v60 = vld [vmem:[%s1236_s8 + $0x70] sm:$0xff]  ;;  %v165_v63 = vld [vmem:[%s1236_s8 + $0x88] sm:$0xff] }
  0x28   : > { %270 = vmatpush.msra.mxu1 %v194_v29  ;;  %312 = vmatpush.msra.mxu2 %v209_v30  ;;  %v160_v61 = vld [vmem:[%s1236_s8 + $0x60] sm:$0xff]  ;;  %v163_v0 = vld [vmem:[%s1236_s8 + $0x78] sm:$0xff]  ;;  %v166_v3 = vld [vmem:[%s1236_s8 + $0x90] sm:$0xff] }
  0x29   : > { %230 = vmatpush.msra.mxu0 %v177_v31  ;;  %v164_v1 = vld [vmem:[%s1236_s8 + $0x80] sm:$0xff]  ;;  %v167_v4 = vld [vmem:[%s1236_s8 + $0x98] sm:$0xff]  ;;  %v169_v6 = vld [vmem:[%s1236_s8 + $0xa8] sm:$0xff] }
  0x2a   : > { %271 = vmatpush.msra.mxu1 %v193_v32  ;;  %313 = vmatpush.msra.mxu2 %v208_v33  ;;  %v168_v2 = vld [vmem:[%s1236_s8 + $0xa0] sm:$0xff]  ;;  %v171_v5 = vld [vmem:[%s1236_s8 + $0xb8] sm:$0xff]  ;;  %v170_v7 = vld [vmem:[%s1236_s8 + $0xb0] sm:$0xff]  ;;  %s769_s8 = scalar_lea.hbm %s1447_s2, %s873_s5 }
  0x2b   : > { %231 = vmatpush.msra.mxu0 %v176_v34  ;;  %s772_s16 = sshll.u32 %s769_s8, 4  ;;  %s773_s16 = int_to_ptr.hbm [resolvable:$true] %s772_s16 }
  0x2c   : > { %272 = vmatpush.msra.mxu1 %v192_v35  ;;  %314 = vmatpush.msra.mxu2 %v207_v36  ;;  %s986_s17 = sshra.s32 %s773_s16, 4  ;;  %s987_s17 = int_to_ptr.hbm [resolvable:$true] %s986_s17 }
  0x2d   : > { %232 = vmatpush.msra.mxu0 %v175_v37  ;;  %s988_s21 = scalar_lea.hbm %s987_s17, 64  ;;  %p993_p0 = scmp.lt.s32.totalorder %s987_s17, %s1447_s2 }
  0x2e   : > { %273 = vmatpush.msra.mxu1 %v191_v38  ;;  %315 = vmatpush.msra.mxu2 %v206_v39  ;;  %p989_p11 = scmp.ne.s32.totalorder %s987_s17, %s988_s21  ;;  %p994_p1 = scmp.lt.s32.totalorder %s992_s23, %s988_s21 }
  0x2f   : > { %233 = vmatpush.msra.mxu0 %v174_v40 }
  0x30   : > { %274 = vmatpush.msra.mxu1 %v190_v41  ;;  %316 = vmatpush.msra.mxu2 %v205_v42  ;;  %p990_p12 = pnand %p989_p11, %p1093_p5  ;;  %p995_p2 = por %p994_p1, %p993_p0 }
  0x31   : > { %234 = vmatpush.msra.mxu0 %v173_v43 }
  0x32   : > { %275 = vmatpush.msra.mxu1 %v189_v44  ;;  %317 = vmatpush.msra.mxu2 %v204_v45  ;;  %p991_p13 = pneg %p990_p12 }
  0x33   : > { %235 = vmatpush.msra.mxu0 %v172_v46  ;;  %318 = vmatmul.f32.vlgmr.msra.gmra.mxu2 %v150_v47 }
  0x34   : > { %276 = vmatpush.msra.mxu1 %v188_v48  ;;  %236 = vmatmul.f32.vlgmr.msra.gmra.mxu0 %v148_v49  ;;  %p996_p3 = pnand %p995_p2, %p991_p13 }
  0x35   : > { %277 = vmatmul.f32.vlgmr.msra.gmra.mxu1 %v149_v50 }
  0x3b   : > { %321 = vmatmul.f32.gmra.mxu2 %v153_v51 }
  0x3c   : > { %239 = vmatmul.f32.gmra.mxu0 %v151_v52 }
  0x3d   : > { %280 = vmatmul.f32.gmra.mxu1 %v152_v53 }
  0x43   : > { %324 = vmatmul.f32.gmra.mxu2 %v156_v54 }
  0x44   : > { %242 = vmatmul.f32.gmra.mxu0 %v154_v55 }
  0x45   : > { %283 = vmatmul.f32.gmra.mxu1 %v155_v56  ;;  %v500_v56 = vlaneseq }
  0x4b   : > { %327 = vmatmul.f32.gmra.mxu2 %v159_v57  ;;  %v501_v57 = vshrl.u32 %v500_v56, 7 }
  0x4c   : > { %245 = vmatmul.f32.gmra.mxu0 %v157_v58  ;;  %v504_v58 = vand.u32 127, %v500_v56 }
  0x4d   : > { %286 = vmatmul.f32.gmra.mxu1 %v158_v59 }
  0x4e   : > { %vm505_vm1 = vcmp.le.s32.totalorder %v504_v58, %v501_v57 }
  0x53   : > { %330 = vmatmul.f32.gmra.mxu2 %v162_v60 }
  0x54   : > { %248 = vmatmul.f32.gmra.mxu0 %v160_v61 }
  0x55   : > { %289 = vmatmul.f32.gmra.mxu1 %v161_v62 }
  0x5b   : > { %333 = vmatmul.f32.gmra.mxu2 %v165_v63  ;;  %v502_v63 = vadd.s32 8, %v501_v57 }
  0x5c   : > { %251 = vmatmul.f32.gmra.mxu0 %v163_v0 }
  0x5d   : > { %292 = vmatmul.f32.gmra.mxu1 %v164_v1  ;;  %vm506_vm3 = vcmp.le.s32.totalorder %v504_v58, %v502_v63 }
  0x63   : > { %336 = vmatmul.f32.gmra.mxu2 %v168_v2 }
  0x64   : > { %254 = vmatmul.f32.gmra.mxu0 %v166_v3 }
  0x65   : > { %295 = vmatmul.f32.gmra.mxu1 %v167_v4 }
  0x6b   : > { %339 = vmatmul.f32.gmra.mxu2 %v171_v5 }
  0x6c   : > { %257 = vmatmul.f32.gmra.mxu0 %v169_v6 }
  0x6d   : > { %298 = vmatmul.f32.gmra.mxu1 %v170_v7 }
  0xb1   : > { %v237_v8 = vpop.f32.mrf.mxu0 }
  0xb2   : > { %v278_v9 = vpop.f32.mrf.mxu1 }
  0xb3   : > { %v279_v18 = vadd.f32 %v278_v9, %v237_v8 }
  0xb6   : > { %v319_v10 = vpop.f32.mrf.mxu2 }
  0xb7   : > { %v1281_v20 = vadd.f32 %v319_v10, %v279_v18 }
  0xb9   : > { %v240_v11 = vpop.f32.mrf.mxu0 }
  0xba   : > { %v281_v12 = vpop.f32.mrf.mxu1 }
  0xbb   : > { %v282_v13 = vadd.f32 %v281_v12, %v240_v11 }
  0xbe   : > { %v322_v14 = vpop.f32.mrf.mxu2 }
  0xbf   : > { %v1277_v15 = vadd.f32 %v322_v14, %v282_v13 }
  0xc1   : > { %347 = vrot.lane.b32.xlu0 %v1277_v15, %s1036_s29  ;;  %v243_v16 = vpop.f32.mrf.mxu0 }
  0xc2   : > { %v284_v17 = vpop.f32.mrf.mxu1 }
  0xc3   : > { %v285_v28 = vadd.f32 %v284_v17, %v243_v16 }
  0xc6   : > { %v325_v19 = vpop.f32.mrf.mxu2 }
  0xc7   : > { %v1289_v30 = vadd.f32 %v325_v19, %v285_v28 }
  0xc9   : > { %345 = vrot.lane.b32.xlu0 %v1281_v20, %s1036_s29  ;;  %v246_v21 = vpop.f32.mrf.mxu0 }
  0xca   : > { %v287_v22 = vpop.f32.mrf.mxu1 }
  0xcb   : > { %v288_v23 = vadd.f32 %v287_v22, %v246_v21 }
  0xce   : > { %v328_v24 = vpop.f32.mrf.mxu2 }
  0xcf   : > { %v1285_v25 = vadd.f32 %v328_v24, %v288_v23 }
  0xd1   : > { %385 = vrot.lane.b32.xlu1 %v1285_v25, %s1036_s29  ;;  %v249_v26 = vpop.f32.mrf.mxu0 }
  0xd2   : > { %v290_v27 = vpop.f32.mrf.mxu1 }
  0xd3   : > { %v291_v36 = vadd.f32 %v290_v27, %v249_v26 }
  0xd6   : > { %v331_v29 = vpop.f32.mrf.mxu2 }
  0xd7   : > { %v1297_v40 = vadd.f32 %v331_v29, %v291_v36 }
  0xd9   : > { %383 = vrot.lane.b32.xlu1 %v1289_v30, %s1036_s29  ;;  %v252_v31 = vpop.f32.mrf.mxu0 }
  0xda   : > { %v293_v32 = vpop.f32.mrf.mxu1 }
  0xdb   : > { %v294_v33 = vadd.f32 %v293_v32, %v252_v31  ;;  %v920_v32 = vpack.i.bf16 %v1281_v20, %v1277_v15 }
  0xde   : > { %v334_v34 = vpop.f32.mrf.mxu2 }
  0xdf   : > { %v1293_v35 = vadd.f32 %v334_v34, %v294_v33 }
  0xe1   : > { %v255_v37 = vpop.f32.mrf.mxu0  ;;  %422 = vrot.lane.b32.xlu2 %v1293_v35, %s1036_s29 }
  0xe2   : > { %v296_v38 = vpop.f32.mrf.mxu1 }
  0xe3   : > { %v297_v39 = vadd.f32 %v296_v38, %v255_v37 }
  0xe6   : > { %v337_v41 = vpop.f32.mrf.mxu2 }
  0xe7   : > { %v1299_v42 = vadd.f32 %v337_v41, %v297_v39 }
  0xe9   : > { %v258_v43 = vpop.f32.mrf.mxu0  ;;  %420 = vrot.lane.b32.xlu2 %v1297_v40, %s1036_s29  ;;  %457 = vrot.lane.b32.xlu1 %v1299_v42, %s1036_s29  ;;  %v935_v63 = vpack.i.bf16 %v1297_v40, %v1299_v42 }
  0xea   : > { %v299_v44 = vpop.f32.mrf.mxu1 }
  0xeb   : > { %v300_v45 = vadd.f32 %v299_v44, %v258_v43 }
  0xee   : > { %v340_v46 = vpop.f32.mrf.mxu2 }
  0xef   : > { %v1305_v47 = vadd.f32 %v340_v46, %v300_v45 }
  0xf1   : > { %459 = vrot.lane.b32.xlu0 %v1305_v47, %s1036_s29 }
 0x133   : > { %v348_v48 = vpop.permute.xlu0 %347 }
 0x134   : > { %842 = vmatpush.xpose.msk.msra.mxu3 %vm349_vm0, %v348_v48 }
 0x13b   : > { %v346_v49 = vpop.permute.xlu0 %345  ;;  %v423_v51 = vpop.permute.xlu2 %422 }
 0x13c   : > { %843 = vmatpush.xpose.msk.msra.mxu3 %vm349_vm0, %v346_v49 }
 0x13f   : > { %844 = vmatmul.msk.f32.vlgmr.msra.gmra.mxu3 %vm349_vm0, %v1281_v20 }
 0x143   : > { %v386_v50 = vpop.permute.xlu1 %385  ;;  %v421_v53 = vpop.permute.xlu2 %420 }
 0x144   : > { %846 = vmatpush.xpose.msk.msrb.mxu3 %vm349_vm0, %v386_v50 }
 0x147   : > { %845 = vmatmul.msk.f32.gmra.mxu3 %vm349_vm0, %v1277_v15 }
 0x14b   : > { %v384_v52 = vpop.permute.xlu1 %383 }
 0x14c   : > { %847 = vmatpush.xpose.msk.msrb.mxu3 %vm349_vm0, %v384_v52 }
 0x14f   : > { %848 = vmatmul.msk.f32.vlgmr.msrb.gmra.mxu3 %vm349_vm0, %v1289_v30 }
 0x150   : > { %850 = vmatpush.xpose.msk.msra.mxu3 %vm349_vm0, %v423_v51 }
 0x154   : > { %851 = vmatpush.xpose.msk.msra.mxu3 %vm349_vm0, %v421_v53  ;;  %v930_v53 = vpack.i.bf16 %v1293_v35, %v1305_v47 }
 0x157   : > { %849 = vmatmul.msk.f32.gmra.mxu3 %vm349_vm0, %v1285_v25 }
 0x15b   : > { %v458_v55 = vpop.permute.xlu1 %457 }
 0x15f   : > { %852 = vmatmul.msk.f32.vlgmr.msra.gmra.mxu3 %vm349_vm0, %v1297_v40 }
 0x163   : > { %v460_v54 = vpop.permute.xlu0 %459 }
 0x164   : > { %854 = vmatpush.xpose.msk.msrb.mxu3 %vm349_vm0, %v460_v54  ;;  %v925_v54 = vpack.i.bf16 %v1289_v30, %v1285_v25 }
 0x167   : > { %853 = vmatmul.msk.f32.gmra.mxu3 %vm349_vm0, %v1293_v35 }
 0x168   : > { %855 = vmatpush.xpose.msk.msrb.mxu3 %vm349_vm0, %v458_v55 }
 0x16f   : > { %856 = vmatmul.msk.f32.vlgmr.msrb.gmra.mxu3 %vm349_vm0, %v1299_v42 }
 0x177   : > { %857 = vmatmul.msk.f32.gmra.mxu3 %vm349_vm0, %v1305_v47 }
 0x1c2   : > { %v375_v59 = vpop.f32.mrf.mxu3 }
 0x1c3   : > { %v492_v60 = vmul.f32 0.05103104, %v375_v59 }
 0x1c5   : > { %v511_v61 = vsel %vm505_vm1, %v492_v60, -inf }
 0x1c6   : > { %v520_v62 = vsel %vm519_vm2, %v511_v61, -inf }
 0x1c7   : > { %521 = vmax.xlane.f32.xlu2 %v520_v62 }
 0x1ca   : > { %v378_v0 = vpop.f32.mrf.mxu3 }
 0x1cb   : > { %v493_v1 = vmul.f32 0.05103104, %v378_v0 }
 0x1cd   : > { %v512_v2 = vsel %vm506_vm3, %v493_v1, -inf }
 0x1ce   : > { %v523_v3 = vsel %vm519_vm2, %v512_v2, -inf }
 0x1cf   : > { %524 = vmax.xlane.f32.xlu0 %v523_v3 }
 0x1d2   : > { %v412_v4 = vpop.f32.mrf.mxu3 }
 0x1d3   : > { %v494_v5 = vmul.f32 0.05103104, %v412_v4 }
 0x1d5   : > { %v513_v6 = vsel %vm505_vm1, %v494_v5, -inf }
 0x1d6   : > { %v526_v7 = vsel %vm519_vm2, %v513_v6, -inf }
 0x1d7   : > { %527 = vmax.xlane.f32.xlu1 %v526_v7 }
 0x1da   : > { %v415_v8 = vpop.f32.mrf.mxu3 }
 0x1db   : > { %v495_v9 = vmul.f32 0.05103104, %v415_v8 }
 0x1dd   : > { %v1340_v10 = vsel %vm506_vm3, %v495_v9, -inf }
 0x1de   : > { %v529_v11 = vsel %vm519_vm2, %v1340_v10, -inf }
 0x1df   : > { %530 = vmax.xlane.f32.xlu2 %v529_v11 }
 0x1e2   : > { %v449_v12 = vpop.f32.mrf.mxu3 }
 0x1e3   : > { %v496_v13 = vmul.f32 0.05103104, %v449_v12 }
 0x1e5   : > { %v1345_v14 = vsel %vm505_vm1, %v496_v13, -inf }
 0x1e6   : > { %v532_v16 = vsel %vm519_vm2, %v1345_v14, -inf }
 0x1e7   : > { %533 = vmax.xlane.f32.xlu1 %v532_v16 }
 0x1ea   : > { %v452_v17 = vpop.f32.mrf.mxu3 }
 0x1eb   : > { %v497_v18 = vmul.f32 0.05103104, %v452_v17 }
 0x1ed   : > { %v516_v19 = vsel %vm506_vm3, %v497_v18, -inf }
 0x1ee   : > { %v535_v21 = vsel %vm519_vm2, %v516_v19, -inf }
 0x1ef   : > { %536 = vmax.xlane.f32.xlu0 %v535_v21 }
 0x1f2   : > { %v486_v22 = vpop.f32.mrf.mxu3 }
 0x1f3   : > { %v498_v23 = vmul.f32 0.05103104, %v486_v22 }
 0x1f5   : > { %v517_v24 = vsel %vm505_vm1, %v498_v23, -inf }
 0x1f6   : > { %v538_v26 = vsel %vm519_vm2, %v517_v24, -inf }
 0x1f7   : > { %539 = vmax.xlane.f32.xlu2 %v538_v26 }
 0x1fa   : > { %v489_v27 = vpop.f32.mrf.mxu3 }
 0x1fb   : > { %v499_v28 = vmul.f32 0.05103104, %v489_v27 }
 0x1fd   : > { %v1354_v29 = vsel %vm506_vm3, %v499_v28, -inf }
 0x1fe   : > { %v541_v31 = vsel %vm519_vm2, %v1354_v29, -inf }
 0x1ff   : > { %542 = vmax.xlane.f32.xlu2 %v541_v31 }
 0x200   : > { %921 = vrot.lane.b32.xlu1 %v920_v32, %s1037_s30 }
 0x23a   : > { %v522_v33 = vpop.xlane.xlu2 %521 }
 0x23b   : > { %v544_v34 = vsub.f32 %v511_v61, %v522_v33 }
 0x23d   : > { %v552_v36 = vmul.f32 1.442695, %v544_v34 }
 0x23f   : > { %940 = vpow2.f32 %v552_v36 }
 0x242   : > { %v525_v37 = vpop.xlane.xlu0 %524 }
 0x243   : > { %v545_v38 = vsub.f32 %v512_v2, %v525_v37 }
 0x245   : > { %v1361_v39 = vpop.eup %940  ;;  %v554_v41 = vmul.f32 1.442695, %v545_v38 }
 0x246   : > { %v568_v43 = vsel %vm519_vm2, %v1361_v39, 0.0 }
 0x247   : > { %942 = vpow2.f32 %v554_v41  ;;  %569 = vadd.xlane.f32.xlu0 %v568_v43 }
 0x24a   : > { %v528_v44 = vpop.xlane.xlu1 %527 }
 0x24b   : > { %v546_v15 = vsub.f32 %v513_v6, %v528_v44 }
 0x24d   : > { %v1365_v20 = vpop.eup %942  ;;  %v556_v45 = vmul.f32 1.442695, %v546_v15 }
 0x24e   : > { %v571_v46 = vsel %vm519_vm2, %v1365_v20, 0.0 }
 0x24f   : > { %944 = vpow2.f32 %v556_v45  ;;  %572 = vadd.xlane.f32.xlu2 %v571_v46 }
 0x252   : > { %v531_v35 = vpop.xlane.xlu2 %530 }
 0x253   : > { %v547_v47 = vsub.f32 %v1340_v10, %v531_v35 }
 0x255   : > { %v1369_v48 = vpop.eup %944  ;;  %v558_v62 = vmul.f32 1.442695, %v547_v47 }
 0x256   : > { %v574_v49 = vsel %vm519_vm2, %v1369_v48, 0.0 }
 0x257   : > { %575 = vadd.xlane.f32.xlu0 %v574_v49 }
 0x25a   : > { %v534_v55 = vpop.xlane.xlu1 %533 }
 0x25b   : > { %v548_v25 = vsub.f32 %v1345_v14, %v534_v55 }
 0x25d   : > { %v560_v0 = vmul.f32 1.442695, %v548_v25 }
 0x262   : > { %v537_v50 = vpop.xlane.xlu0 %536 }
 0x263   : > { %v549_v51 = vsub.f32 %v516_v19, %v537_v50 }
 0x265   : > { %v562_v52 = vmul.f32 1.442695, %v549_v51 }
 0x267   : > { %946 = vpow2.f32 %v562_v52  ;;  %931 = vrot.lane.b32.xlu2 %v930_v53, %s1037_s30 }
 0x268   : > { %948 = vpow2.f32 %v558_v62 }
 0x269   : > { %950 = vpow2.f32 %v560_v0 }
 0x26a   : > { %v540_v61 = vpop.xlane.xlu2 %539 }
 0x26b   : > { %926 = vrot.lane.b32.xlu0 %v925_v54, %s1037_s30  ;;  %v550_v30 = vsub.f32 %v517_v24, %v540_v61 }
 0x26d   : > { %v1379_v56 = vpop.eup %946  ;;  %v564_v1 = vmul.f32 1.442695, %v550_v30 }
 0x26e   : > { %v583_v57 = vsel %vm519_vm2, %v1379_v56, 0.0  ;;  %v949_v3 = vpop.eup %948 }
 0x26f   : > { %584 = vadd.xlane.f32.xlu1 %v583_v57  ;;  %952 = vpow2.f32 %v564_v1  ;;  %v577_v5 = vsel %vm519_vm2, %v949_v3, 0.0  ;;  %v951_v6 = vpop.eup %950 }
 0x270   : > { %v580_v9 = vsel %vm519_vm2, %v951_v6, 0.0 }
 0x272   : > { %v922_v58 = vpop.permute.xlu1 %921  ;;  %v543_v2 = vpop.xlane.xlu2 %542 }
 0x273   : > { %v923_v59 = vunpack.i.l.bf16 %v922_v58  ;;  %v924_v60 = vunpack.i.h.bf16 %v922_v58  ;;  %v551_v4 = vsub.f32 %v1354_v29, %v543_v2 }
 0x275   : > { %634 = vmatpush.msra.mxu3 %v923_v59  ;;  %v566_v7 = vmul.f32 1.442695, %v551_v4  ;;  %v953_v8 = vpop.eup %952 }
 0x276   : > { %v586_v40 = vsel %vm519_vm2, %v953_v8, 0.0 }
 0x277   : > { %635 = vmatpush.msra.mxu3 %v924_v60  ;;  %954 = vpow2.f32 %v566_v7 }
 0x27d   : > { %v955_v42 = vpop.eup %954 }
 0x27e   : > { %v589_v10 = vsel %vm519_vm2, %v955_v42, 0.0 }
 0x288   : > { %936 = vrot.lane.b32.xlu1 %v935_v63, %s1037_s30 }
 0x290   : > { %578 = vadd.xlane.f32.xlu2 %v577_v5 }
 0x295   : > { %581 = vadd.xlane.f32.xlu0 %v580_v9 }
 0x298   : > { %587 = vadd.xlane.f32.xlu2 %v586_v40 }
 0x2a0   : > { %590 = vadd.xlane.f32.xlu2 %v589_v10 }
 0x2ba   : > { %v570_v11 = vpop.xlane.xlu0 %569 }
 0x2bb   : > { %956 = vrcp.f32 %v570_v11 }
 0x2c1   : > { %v957_v12 = vpop.eup %956 }
 0x2c2   : > { %v600_v13 = vmul.f32 %v957_v12, %v1361_v39  ;;  %v573_v14 = vpop.xlane.xlu2 %572 }
 0x2c3   : > { %958 = vrcp.f32 %v573_v14 }
 0x2c4   : > { %858 = vmatmul.msk.f32.vlgmr.msra.gmra.mxu3 %vm519_vm2, %v600_v13 }
 0x2c9   : > { %v959_v16 = vpop.eup %958 }
 0x2ca   : > { %v932_v17 = vpop.permute.xlu2 %931  ;;  %v601_v18 = vmul.f32 %v959_v16, %v1365_v20  ;;  %v576_v22 = vpop.xlane.xlu0 %575 }
 0x2cb   : > { %v934_v19 = vunpack.i.h.bf16 %v932_v17  ;;  %v933_v21 = vunpack.i.l.bf16 %v932_v17  ;;  %960 = vrcp.f32 %v576_v22 }
 0x2cc   : > { %859 = vmatmul.msk.f32.gmra.mxu3 %vm519_vm2, %v601_v18 }
 0x2cd   : > { %704 = vmatpush.msrb.mxu0 %v934_v19  ;;  %874 = vmatpush.msrb.mxu2 %v934_v19 }
 0x2ce   : > { %739 = vmatpush.msrb.mxu1 %v933_v21 }
 0x2d1   : > { %v961_v24 = vpop.eup %960 }
 0x2d2   : > { %v602_v28 = vmul.f32 %v961_v24, %v1369_v48 }
 0x2dd   : > { %v927_v23 = vpop.permute.xlu0 %926 }
 0x2de   : > { %v928_v26 = vunpack.i.l.bf16 %v927_v23  ;;  %v929_v27 = vunpack.i.h.bf16 %v927_v23 }
 0x2e0   : > { %669 = vmatpush.msrb.mxu3 %v928_v26 }
 0x2e2   : > { %670 = vmatpush.msrb.mxu3 %v929_v27  ;;  %v585_v29 = vpop.xlane.xlu1 %584 }
 0x2e3   : > { %860 = vmatmul.msk.f32.vlgmr.msrb.gmra.mxu3 %vm519_vm2, %v602_v28  ;;  %962 = vrcp.f32 %v585_v29 }
 0x2e9   : > { %v963_v31 = vpop.eup %962 }
 0x2ea   : > { %v605_v36 = vmul.f32 %v963_v31, %v1379_v56 }
 0x2fa   : > { %v937_v32 = vpop.permute.xlu1 %936 }
 0x2fb   : > { %v939_v33 = vunpack.i.h.bf16 %v937_v32  ;;  %v938_v34 = vunpack.i.l.bf16 %v937_v32 }
 0x2fd   : > { %705 = vmatpush.msrb.mxu0 %v939_v33  ;;  %875 = vmatpush.msrb.mxu2 %v939_v33 }
 0x2fe   : > { %740 = vmatpush.msrb.mxu1 %v938_v34  ;;  %863 = vmatmul.msk.f32.vlgmr.msrb.gmra.mxu2 %vm519_vm2, %v605_v36 }
 0x303   : > { %v579_v37 = vpop.xlane.xlu2 %578 }
 0x304   : > { %964 = vrcp.f32 %v579_v37 }
 0x308   : > { %v582_v38 = vpop.xlane.xlu0 %581 }
 0x309   : > { %966 = vrcp.f32 %v582_v38 }
 0x30a   : > { %v965_v39 = vpop.eup %964 }
 0x30b   : > { %v588_v41 = vpop.xlane.xlu2 %587  ;;  %v603_v43 = vmul.f32 %v965_v39, %v949_v3 }
 0x30c   : > { %968 = vrcp.f32 %v588_v41 }
 0x30d   : > { %861 = vmatmul.msk.f32.gmra.mxu3 %vm519_vm2, %v603_v43 }
 0x30f   : > { %v967_v44 = vpop.eup %966 }
 0x310   : > { %v604_v15 = vmul.f32 %v967_v44, %v951_v6 }
 0x312   : > { %v969_v20 = vpop.eup %968  ;;  %862 = vmatmul.msk.f32.vlgmr.msrb.gmra.mxu0 %vm519_vm2, %v604_v15 }
 0x313   : > { %v591_v45 = vpop.xlane.xlu2 %590  ;;  %v606_v46 = vmul.f32 %v969_v20, %v953_v8 }
 0x314   : > { %970 = vrcp.f32 %v591_v45 }
 0x315   : > { %864 = vmatmul.msk.f32.vlgmr.msrb.gmra.mxu1 %vm519_vm2, %v606_v46 }
 0x31a   : > { %v971_v48 = vpop.eup %970 }
 0x31b   : > { %v607_v49 = vmul.f32 %v971_v48, %v955_v42 }
 0x31d   : > { %865 = vmatmul.msk.f32.gmra.mxu1 %vm519_vm2, %v607_v49 }
 0x347   : > { %v637_v50 = vpop.f32.mrf.mxu3 }
 0x348   : > { %748 = vst.msk [vmem:[%s139_s25] sm:$0xff] %vm349_vm0, %v637_v50 }
 0x34f   : > { %v640_v51 = vpop.f32.mrf.mxu3 }
 0x350   : > { %749 = vst.msk [vmem:[%s139_s25 + $0x8] sm:$0xff] %vm349_vm0, %v640_v51 }
 0x366   : > { %v672_v52 = vpop.f32.mrf.mxu3 }
 0x367   : > { %750 = vst.msk [vmem:[%s139_s25 + $0x10] sm:$0xff] %vm349_vm0, %v672_v52 }
 0x381   : > { %v710_v53 = vpop.f32.mrf.mxu2 }
 0x382   : > { %753 = vst.msk [vmem:[%s139_s25 + $0x28] sm:$0xff] %vm349_vm0, %v710_v53 }
 0x38f   : > { %v707_v54 = vpop.f32.mrf.mxu0 }
 0x390   : > { %752 = vst.msk [vmem:[%s139_s25 + $0x20] sm:$0xff] %vm349_vm0, %v707_v54  ;;  %v675_v55 = vpop.f32.mrf.mxu3 }
 0x391   : > { %751 = vst.msk [vmem:[%s139_s25 + $0x18] sm:$0xff] %vm349_vm0, %v675_v55 }
 0x392   : > { %v742_v56 = vpop.f32.mrf.mxu1 }
 0x393   : > { %754 = vst.msk [vmem:[%s139_s25 + $0x30] sm:$0xff] %vm349_vm0, %v742_v56 }
 0x39a   : > { %v745_v57 = vpop.f32.mrf.mxu1 }
 0x39b   : > { %755 = vst.msk [vmem:[%s139_s25 + $0x38] sm:$0xff] %vm349_vm0, %v745_v57 }
 0x39c   : > { %999 = shalt.err (!%p996_p3)
}
 0x39d   : > { %s1038_s28 = smov 128   ;;  %s1039_s29 = smov 8  }
 0x39e   : > { %877 = dma.vmem_to_hbm [thread:$0]  (%p1093_p5), %s771_s14, 1024, %s773_s16, %s757_s13, %s1038_s28, %s1038_s28, %s1039_s29  }
 0x39f PF: > { %p883_p4 = scmp.ge.s32.totalorder %s1034_s12, 2  ;;  %s787_s30 = sand.u32 1, %s1022_s9  }
 0x3a0   : > { %s788_s3 = scalar_lea.sflag [#allocation3], %s787_s30 }
 0x3a1   : > { %p880_p7 = pnand %p883_p4, %p1097_p6 }
 0x3a3   : > { %p881_p8 = pneg %p880_p7 }
 0x3a5   : > { %1017 = dma.done.wait (%p881_p8), %s788_s3, 1024  }
 0x3a6   : > { %1019 = vsyncadd (%p881_p8), %s788_s3, 4294966272  ;;  %p12_p9 = scmp.ge.s32.totalorder %s1080_s15, 4   ;;  %s1450_s9 = smov %s1026_s10 }
 0x3a7   : > { %s1451_s10 = smov %s1030_s11  ;;  %s1452_s11 = smov %s1091_s18 }
 0x3a8   : > { %s1453_s12 = smov %s1080_s15  ;;  %14 = sbr.rel (!%p12_p9) target bundleno = 3 (0x3), region = 63 }
 0x3ad   :  { %794 = vsyncpa [#allocation3], 1 }
 0x3ae   :  { %796 = vsyncpa [#allocation3 + $0x1], 1 }

</bundles_post_ra>
